<compile_context>
chip_gen: v5e
topology: v5e:2x2
jax: 0.10.0
libtpu: 0.0.40
codegen_flags: <defaults>
</compile_context>

<pallas_src>
import functools
import math

import jax
import jax.numpy as jnp
from jax import lax
from jax.experimental import pallas as pl
from jax.experimental.pallas import tpu as pltpu


def _cdiv(a, b):
    return -(-a // b)


def _round_up(x, m):
    return ((x + m - 1) // m) * m


def _vmem_capacity_bytes():
    """Trace-time VMEM capacity query with a conservative (v7x) fallback."""
    try:
        info = pltpu.get_tpu_info()
        for attr in ("vmem_capacity_bytes", "vmem_bytes", "vmem_size_bytes"):
            v = getattr(info, attr, None)
            if v:
                return int(v)
    except Exception:
        pass
    return 64 * 1024 * 1024  # conservative: v7x per-TC VMEM


_VMEM_CAP = _vmem_capacity_bytes()
# Scoped-VMEM limit: 96 MiB on 128-MiB chips (v5e/v6e), 48 MiB on v7x (64 MiB).
_VMEM_LIMIT = min(max(_VMEM_CAP - 16 * 1024 * 1024, 32 * 1024 * 1024), 96 * 1024 * 1024)
# Per double-buffered input buffer budget for GAP: ~16 MiB (v5e/v6e), ~8 MiB (v7x).
_GAP_TILE_BYTES = max(4 * 1024 * 1024, _VMEM_CAP // 8)


# ----------------------------------------------------------------------------
# Global average pooling kernel (the CLIPPooling neck hot path)
# ----------------------------------------------------------------------------
def _gap_kernel(inv_l, x_ref, o_ref):
    # x_ref: (TR, L) rows of flattened (B*C, H*W); reduce over the lane axis.
    x = x_ref[...].astype(jnp.float32)
    o_ref[...] = (jnp.sum(x, axis=-1, keepdims=True) * inv_l).astype(o_ref.dtype)


def _row_tile(n_rows, n_cols, itemsize):
    """Row tile sized against the *padded* VMEM footprint; even, equal steps."""
    padded_row_bytes = _round_up(max(n_cols, 1), 128) * itemsize  # lane padding
    total_padded = _round_up(n_rows, 8) * padded_row_bytes
    # Small arrays: single grid step (per-step overhead would dominate anyway).
    if n_rows <= 512 or total_padded <= 2 * 1024 * 1024:
        return n_rows
    max_rows = max(8, _GAP_TILE_BYTES // padded_row_bytes)
    n_steps = max(2, _cdiv(n_rows, max_rows))
    if n_steps % 2:
        n_steps += 1  # even, equal-sized steps -> balanced across v7x's 2 TCs
    tr = _round_up(_cdiv(n_rows, n_steps), 8)
    while tr * padded_row_bytes > _GAP_TILE_BYTES and tr > 8:
        n_steps += 2
        tr = _round_up(_cdiv(n_rows, n_steps), 8)
    return min(tr, n_rows)


def clip_pooling_gap(x):
    """AdaptiveAvgPool((1,)*d) + view(B, -1) for a single (B, C, *spatial) tensor."""
    B, C = x.shape[0], x.shape[1]
    L = int(math.prod(x.shape[2:]))
    R = B * C
    x2 = x.reshape(R, L)  # contiguous view: spatial dims land on the lane axis

    tr = _row_tile(R, L, x.dtype.itemsize)
    grid = (_cdiv(R, tr),)

    out = pl.pallas_call(
        functools.partial(_gap_kernel, 1.0 / L),
        out_shape=jax.ShapeDtypeStruct((R, 1), x.dtype),
        grid=grid,
        in_specs=[pl.BlockSpec((tr, L), lambda i: (i, 0))],
        out_specs=pl.BlockSpec((tr, 1), lambda i: (i, 0)),
        compiler_params=pltpu.CompilerParams(
            dimension_semantics=("parallel",),
            vmem_limit_bytes=_VMEM_LIMIT,
        ),
    )(x2)
    return out.reshape(B, C)


def clip_pooling_forward(inputs):
    """CLIPPooling.forward with Table=False (tuple or tensor inputs)."""
    if isinstance(inputs, tuple):
        return tuple(clip_pooling_gap(x) for x in inputs)
    if isinstance(inputs, jax.Array):
        return clip_pooling_gap(inputs)
    raise TypeError("neck inputs should be tuple or jax.Array")


# ----------------------------------------------------------------------------
# CrossAttention kernel (dependent class): fused q/kv projections, scaled
# dot-product softmax attention, output projection.
# x1: (B, in_dim1), x2: (S, in_dim2) -> out: (B, in_dim1)
# ----------------------------------------------------------------------------
def _cross_attn_kernel(k_dim, x1_ref, x2_ref,
                       wq_ref, bq_ref, wkv_ref, bkv_ref,
                       wo_ref, bo_ref, o_ref):
    # No explicit f32 upcast of activations: preferred_element_type gives f32
    # accumulation while letting bf16 inputs use native bf16 MXU passes.
    x1 = x1_ref[...]
    x2 = x2_ref[...]

    q1 = jnp.dot(x1, wq_ref[...], preferred_element_type=jnp.float32) + bq_ref[...]
    # Fused k/v projection: one MXU matmul instead of two tiny ones.
    kv2 = jnp.dot(x2, wkv_ref[...], preferred_element_type=jnp.float32) + bkv_ref[...]
    k2 = kv2[:, :k_dim]
    v2 = kv2[:, k_dim:]

    # attn = q1 @ k2^T / sqrt(8): contract the shared k_dim on the MXU directly
    # (no materialized transpose).  NOTE: matches PyTorch's literal `/ 8 ** 0.5`,
    # which equals 1/sqrt(k_dim) only because k_dim == 8 in this configuration.
    attn = lax.dot_general(q1, k2, (((1,), (1,)), ((), ())),
                           preferred_element_type=jnp.float32) * (8.0 ** -0.5)

    m = jnp.max(attn, axis=-1, keepdims=True)
    p = jnp.exp(attn - m)
    # approx reciprocal (EUP slot, ~1e-3 accuracy) -- fine for inference.
    probs = p * pl.reciprocal(jnp.sum(p, axis=-1, keepdims=True), approx=True)

    out = jnp.dot(probs, v2, preferred_element_type=jnp.float32)
    out = jnp.dot(out, wo_ref[...], preferred_element_type=jnp.float32) + bo_ref[...]
    o_ref[...] = out.astype(o_ref.dtype)


def cross_attention(x1, x2, params):
    B, in_dim1 = x1.shape
    S, in_dim2 = x2.shape
    k_dim = params["wq"].shape[1]

    # Fuse the x2-side projection weights once, outside the kernel (tiny).
    wkv = jnp.concatenate([params["wk"], params["wv"]], axis=1)
    bkv = jnp.concatenate([params["bk"], params["bv"]], axis=1)

    # Row grid over B (single step at toy sizes); weights use constant-index
    # BlockSpecs so they stay VMEM-resident while activations stream.
    tb = B if B <= 256 else 256
    grid = (_cdiv(B, tb),)
    const = lambda i: (0, 0)

    return pl.pallas_call(
        functools.partial(_cross_attn_kernel, k_dim),
        out_shape=jax.ShapeDtypeStruct((B, in_dim1), x1.dtype),
        grid=grid,
        in_specs=[
            pl.BlockSpec((tb, in_dim1), lambda i: (i, 0)),   # x1 streamed over B
            pl.BlockSpec((S, in_dim2), const),               # x2 resident
            pl.BlockSpec(params["wq"].shape, const),
            pl.BlockSpec(params["bq"].shape, const),
            pl.BlockSpec(wkv.shape, const),
            pl.BlockSpec(bkv.shape, const),
            pl.BlockSpec(params["wo"].shape, const),
            pl.BlockSpec(params["bo"].shape, const),
        ],
        out_specs=pl.BlockSpec((tb, in_dim1), lambda i: (i, 0)),
        compiler_params=pltpu.CompilerParams(
            dimension_semantics=("parallel",),
            vmem_limit_bytes=min(_VMEM_LIMIT, 32 * 1024 * 1024),
        ),
    )(x1, x2,
      params["wq"], params["bq"], wkv, bkv, params["wo"], params["bo"])


def init_cross_attention_params(key, in_dim1, in_dim2, k_dim, v_dim):
    ks = jax.random.split(key, 8)
    s = 0.05
    return {
        "wq": s * jax.random.normal(ks[0], (in_dim1, k_dim), jnp.float32),
        "bq": s * jax.random.normal(ks[1], (1, k_dim), jnp.float32),
        "wk": s * jax.random.normal(ks[2], (in_dim2, k_dim), jnp.float32),
        "bk": s * jax.random.normal(ks[3], (1, k_dim), jnp.float32),
        "wv": s * jax.random.normal(ks[4], (in_dim2, v_dim), jnp.float32),
        "bv": s * jax.random.normal(ks[5], (1, v_dim), jnp.float32),
        "wo": s * jax.random.normal(ks[6], (v_dim, in_dim1), jnp.float32),
        "bo": s * jax.random.normal(ks[7], (1, in_dim1), jnp.float32),
    }


# ----------------------------------------------------------------------------
# Plain-JAX references for correctness checks
# ----------------------------------------------------------------------------
def _gap_ref(x):
    return jnp.mean(x.reshape(x.shape[0], x.shape[1], -1), axis=-1)


def _cross_attn_ref(x1, x2, p):
    q1 = x1 @ p["wq"] + p["bq"]
    k2 = x2 @ p["wk"] + p["bk"]
    v2 = x2 @ p["wv"] + p["bv"]
    attn = jax.nn.softmax((q1 @ k2.T) / (8.0 ** 0.5), axis=-1)
    return (attn @ v2) @ p["wo"] + p["bo"]


if __name__ == "__main__":
    key = jax.random.PRNGKey(0)
    k_img, k_img2, k_img3, k_x1, k_x2, k_params = jax.random.split(key, 6)

    # --- CLIPPooling GAP path: single tensor, tuple-of-tensors ---
    x = jax.random.normal(k_img, (2, 4, 16, 16), jnp.float32)   # NCHW
    out = clip_pooling_forward(x)
    jax.block_until_ready(out)
    assert out.shape == (2, 4)
    assert jnp.allclose(out, _gap_ref(x), atol=1e-5), "GAP mismatch"

    x_small = jax.random.normal(k_img2, (2, 4, 8, 8), jnp.float32)
    outs = clip_pooling_forward((x, x_small))
    jax.block_until_ready(outs)
    assert jnp.allclose(outs[1], _gap_ref(x_small), atol=1e-5), "GAP tuple mismatch"

    # --- CLIP-like feature-map size exercising the tiled, multi-step grid ---
    x_big = jax.random.normal(k_img3, (3, 2048, 14, 14), jnp.float32)
    out_big = clip_pooling_forward(x_big)
    jax.block_until_ready(out_big)
    assert out_big.shape == (3, 2048)
    assert jnp.allclose(out_big, _gap_ref(x_big), atol=1e-4), "GAP tiled mismatch"

    # --- CrossAttention dependent class ---
    B, S = 2, 8
    in_dim1, in_dim2, k_dim, v_dim = 32, 16, 8, 8
    x1 = jax.random.normal(k_x1, (B, in_dim1), jnp.float32)
    x2 = jax.random.normal(k_x2, (S, in_dim2), jnp.float32)
    params = init_cross_attention_params(k_params, in_dim1, in_dim2, k_dim, v_dim)
    y = cross_attention(x1, x2, params)
    jax.block_until_ready(y)
    assert y.shape == (B, in_dim1)
    # atol loosened slightly for pl.reciprocal(approx=True) in the softmax.
    assert jnp.allclose(y, _cross_attn_ref(x1, x2, params), atol=2e-3), "CrossAttention mismatch"

    print("KERNEL_OK")
</pallas_src>

<mosaic_0001>
module attributes {stable_mosaic.version = 11 : i64} {
  func.func @_gap_kernel(%arg0: i32, %arg1: memref<8x256xf32, #tpu.memory_space<vmem>>, %arg2: memref<8x1xf32, #tpu.memory_space<vmem>>) attributes {dimension_semantics = [#tpu.dimension_semantics<parallel>], iteration_bounds = array<i64: 1>, scalar_prefetch = 0 : i64, scratch_operands = 0 : i64, tpu.core_type = #tpu.core_type<tc>, window_params = [{transform_indices = @transform_0, window_bounds = array<i64: 8, 256>}, {transform_indices = @transform_1, window_bounds = array<i64: 8, 1>}]} {
    %c0 = arith.constant 0 : index
    %c0_0 = arith.constant 0 : index
    %0 = vector.load %arg1[%c0, %c0_0] : memref<8x256xf32, #tpu.memory_space<vmem>>, vector<8x256xf32>
    %cst = arith.constant dense<0.000000e+00> : vector<8xf32>
    %1 = vector.multi_reduction <add>, %0, %cst [1] : vector<8x256xf32> to vector<8xf32>
    %2 = vector.shape_cast %1 : vector<8xf32> to vector<8x1xf32>
    %cst_1 = arith.constant 3.906250e-03 : f32
    %3 = vector.broadcast %cst_1 : f32 to vector<8x1xf32>
    %4 = arith.mulf %2, %3 : vector<8x1xf32>
    %c0_2 = arith.constant 0 : index
    %c0_3 = arith.constant 0 : index
    %5 = vector.load %arg2[%c0_2, %c0_3] : memref<8x1xf32, #tpu.memory_space<vmem>>, vector<8x1xf32>
    tpu.vector_store %arg2[%c0_2, %c0_3], %4 {strides = array<i32>} : memref<8x1xf32, #tpu.memory_space<vmem>>, vector<8x1xf32>,
    return
  }
  func.func @transform_0(%arg0: i32) -> (i32, i32) {
    %c0_i32 = arith.constant 0 : i32
    %c0_i32_0 = arith.constant 0 : i32
    return %arg0, %c0_i32 : i32, i32
  }
  func.func @transform_1(%arg0: i32) -> (i32, i32) {
    %c0_i32 = arith.constant 0 : i32
    %c0_i32_0 = arith.constant 0 : i32
    return %arg0, %c0_i32 : i32, i32
  }
}

</mosaic_0001>

<bundles_post_ra>
// kernel: tpu_custom_call.1
= control target key start
LH: loop header
LB: loop body
LE: loop exit
PB: predicated region body
PF: predicated region fallthrough
CT: control target
= control target key end

     0   :  { %6 = vsyncpa [#allocation3], 0  ;;  %s62_s9 = smov [#allocation2]   ;;  %s79_s0 = inlined_call_operand.hbm [shape: f32[8,256], index: 0, kind: input, shape index: {}]   ;;  %s80_s1 = inlined_call_operand.vmem [shape: f32[8,1], index: 1, kind: output, shape index: {}]  }
   0x1   :  { %s12_s8 = sshll.u32 %s79_s0, 4  ;;  %s14_s10 = sshll.u32 %s62_s9, 4  ;;  %s13_s8 = int_to_ptr.hbm [resolvable:$true] %s12_s8  ;;  %s15_s10 = int_to_ptr.vmem [resolvable:$true] %s14_s10 }
   0x2   :  { %17 = dma.hbm_to_vmem [thread:$0]  %s13_s8, 256, %s15_s10, [#allocation3]  }
   0x3   :  { %60 = dma.done.wait [#allocation3], 256  }
   0x4   :  { %61 = vsyncadd [#allocation3], 4294967040  ;;  %v22_v0 = vld [vmem:[#allocation2] sm:$0xff]  ;;  %v23_v1 = vld [vmem:[#allocation2 + $0x8] sm:$0xff]  ;;  %vm28_vm0 = vcmask 7168  }
   0x5   :  { %v24_v2 = vadd.f32 %v23_v1, %v22_v0 }
   0x7   :  { %25 = vadd.xlane.f32.xlu0 %v24_v2 }
  0x7a   :  { %v26_v3 = vpop.xlane.xlu0 %25 }
  0x7b   :  { %v27_v4 = vmul.f32 0.00390625, %v26_v3 }
  0x7d   :  { %29 = vst.msk [vmem:[%s80_s1] sm:$0xff] %vm28_vm0, %v27_v4 }
  0x7e   :  { %34 = vsyncpa [#allocation3], 1 }

</bundles_post_ra>
